<compile_context>
chip_gen: v7x
topology: tpu7x:2x2x1
jax: 0.10.0
libtpu: 0.0.40
codegen_flags: <defaults>
</compile_context>

<pallas_src>
import functools

import jax
import jax.numpy as jnp
import numpy as np
from jax.experimental import pallas as pl
from jax.experimental.pallas import tpu as pltpu

LEAKY_SLOPE = 0.2
EPS = 1e-5
PAD = 128  # flat zero border; multiple of 128 keeps the interior lane-aligned


def _leaky_relu(v):
    return jnp.where(v > 0, v, LEAKY_SLOPE * v)


def _hin_res_block_kernel(x_ref, w1_ref, b1_ref, w2_ref, b2_ref,
                          g_ref, bt_ref, inm_ref, colm_ref,
                          o_ref, pad_ref, col_ref, *, W, matmul_dtype):
    R, HW = o_ref.shape        # R = B*C rows (B images stacked on sublanes)
    GBC = 3 * R                # im2col rows per horizontal-offset (dw) group

    # Zero the flat-padding borders (one vreg tile per side).  Done every grid
    # step on purpose: under "parallel" grid splitting each TensorCore gets a
    # private scratch, so a program_id==0 gate would be wrong on core 1.
    zpad = jnp.zeros((R, PAD), jnp.float32)
    pad_ref[:, :PAD] = zpad
    pad_ref[:, PAD + HW:] = zpad

    x = x_ref[...]                                            # (R, HW)
    # Hoist the two column-validity masks to full (R, HW) slabs once; they are
    # reused by both convs (JAX does not CSE broadcast_in_dim).
    m_left = jnp.broadcast_to(colm_ref[0:1, :], (R, HW))
    m_right = jnp.broadcast_to(colm_ref[1:2, :], (R, HW))

    def conv3x3(w_ref, b_ref):
        """3x3 zero-padded conv of the scratch interior via im2col + MXU."""
        # 1) im2col: one contiguous full-sublane store per tap.  Taps ordered
        #    dw-major so each dw group is a contiguous row slab.  The zero
        #    border of the scratch handles all vertically out-of-range taps.
        for g, dw in enumerate((-1, 0, 1)):
            for j, dh in enumerate((-1, 0, 1)):
                t = g * 3 + j
                off = dh * W + dw
                col_ref[t * R:(t + 1) * R, :] = (
                    pad_ref[:, PAD + off:PAD + off + HW])

        # 2) one MXU matmul per dw group; the row-wrap masks are applied once
        #    per group to the (R, HW) partial output (not to each window).
        def group_dot(g):
            return jnp.dot(
                w_ref[g].astype(matmul_dtype),
                col_ref[g * GBC:(g + 1) * GBC, :].astype(matmul_dtype),
                preferred_element_type=jnp.float32)

        acc = group_dot(1)                    # dw =  0 : no mask needed
        acc = acc + m_left * group_dot(0)     # dw = -1
        acc = acc + m_right * group_dot(2)    # dw = +1
        return acc + b_ref[...]

    # conv_1 + LeakyReLU
    pad_ref[:, PAD:PAD + HW] = x
    r = _leaky_relu(conv3x3(w1_ref, b1_ref))

    # HIN half-InstanceNorm: per-(image, channel) stats over the lane axis;
    # per-row affine + row-select realize chunk/IN/concat with no data
    # movement (biased variance, eps=1e-5, matching nn.InstanceNorm2d).
    mean = jnp.mean(r, axis=1, keepdims=True)
    var = jnp.mean((r - mean) ** 2, axis=1, keepdims=True)
    normed = (r - mean) * jax.lax.rsqrt(var + EPS) * g_ref[...] + bt_ref[...]
    r = jnp.where(inm_ref[...] > 0.5, normed, r)

    # conv_2 + LeakyReLU, then residual add (straight lane-dense vadd).
    pad_ref[:, PAD:PAD + HW] = r
    o_ref[...] = x + _leaky_relu(conv3x3(w2_ref, b2_ref))


def _pick_image_tile(N, C):
    """Smallest B dividing N whose B*C fills the 8-sublane vreg axis.

    Smallest such B keeps the most grid steps (v7x has 2 TensorCores and the
    batch grid is marked "parallel"); for realistic N both goals are met.
    """
    for B in range(1, N + 1):
        if N % B == 0 and (B * C) % 8 == 0:
            return B
    for B in range(1, N + 1):
        if N % B == 0 and B * C >= 8:
            return B
    return N


def _pack_weights(w, B):
    """(Cout, Cin, 3, 3) -> (3 dw groups, B*C, 3*B*C), block-diag over images.

    Row = b*C + cout; within-group column = (dh_idx*B + b)*C + cin, matching
    the im2col row layout built in the kernel (tap order: dw-major, then dh).
    """
    C = w.shape[0]
    wt = jnp.transpose(w.astype(jnp.float32), (3, 2, 0, 1))  # (dw, dh, Cout, Cin)
    eye_b = jnp.eye(B, dtype=jnp.float32)
    big = jnp.einsum('gjoc,pq->gpojqc', wt, eye_b)            # zero across images
    return big.reshape(3, B * C, 3 * B * C)


def hin_res_block_forward(x_nchw, w1, b1, w2, b2, gamma, beta,
                          *, matmul_dtype=jnp.float32, image_tile=None):
    """HinResBlock forward.

    x_nchw: (N, C, H, W) float32.  Conv weights in PyTorch (Cout, Cin, 3, 3)
    layout, biases (C,), InstanceNorm affine params (C//2,).
    matmul_dtype: dtype of the MXU operands (jnp.bfloat16 for v6e/v7x fast
    path; accumulation and all elementwise math stay float32).
    Returns (N, C, H, W) float32.
    """
    N, C, H, W = x_nchw.shape
    HW = H * W
    Ch = C // 2
    assert W + 1 <= PAD, "flat zero border must cover a full row shift"

    B = image_tile if image_tile is not None else _pick_image_tile(N, C)
    assert N % B == 0
    G = N // B
    R = B * C

    # NCHW kept end-to-end: (N, C, H, W) -> (N//B, B*C, H*W) is a free reshape.
    x_flat = x_nchw.astype(jnp.float32).reshape(G, R, HW)

    w1p = _pack_weights(w1, B)
    w2p = _pack_weights(w2, B)

    def per_row(first_half, fill):
        full = jnp.concatenate(
            [first_half.astype(jnp.float32),
             jnp.full((C - first_half.shape[0],), fill, jnp.float32)])
        return jnp.tile(full, (B,)).reshape(R, 1)

    b1_row = jnp.tile(b1.astype(jnp.float32), (B,)).reshape(R, 1)
    b2_row = jnp.tile(b2.astype(jnp.float32), (B,)).reshape(R, 1)
    g_row = per_row(gamma, 1.0)                               # gamma / 1
    bt_row = per_row(beta, 0.0)                               # beta  / 0
    inm_row = per_row(jnp.ones((Ch,), jnp.float32), 0.0)      # 1 = IN row

    # Host-side column-validity masks (kill the horizontal row-wrap reads).
    col = np.arange(HW) % W
    colmask = jnp.asarray(
        np.stack([(col >= 1), (col <= W - 2)]).astype(np.float32))  # (2, HW)

    # Explicit VMEM budget: double-buffered in/out blocks, packed weights,
    # padded scratch + im2col scratch, generous headroom; < v7x's 64 MiB.
    est = 4 * (2 * 2 * R * HW + 2 * 2 * 9 * R * R + R * (2 * PAD + HW)
               + 9 * R * HW + 16 * R + 2 * HW)
    vmem_limit = int(min(48 * 1024 * 1024, max(16 * 1024 * 1024, 4 * est)))

    kernel = functools.partial(_hin_res_block_kernel, W=W,
                               matmul_dtype=matmul_dtype)
    rep2 = lambda n: (0, 0)
    rep3 = lambda n: (0, 0, 0)

    out = pl.pallas_call(
        kernel,
        out_shape=jax.ShapeDtypeStruct((G, R, HW), jnp.float32),
        grid=(G,),
        in_specs=[
            pl.BlockSpec((None, R, HW), lambda n: (n, 0, 0)),   # x
            pl.BlockSpec((3, R, 3 * R), rep3),                  # w1 (packed)
            pl.BlockSpec((R, 1), rep2),                         # b1 rows
            pl.BlockSpec((3, R, 3 * R), rep3),                  # w2 (packed)
            pl.BlockSpec((R, 1), rep2),                         # b2 rows
            pl.BlockSpec((R, 1), rep2),                         # gamma rows
            pl.BlockSpec((R, 1), rep2),                         # beta rows
            pl.BlockSpec((R, 1), rep2),                         # IN row mask
            pl.BlockSpec((2, HW), rep2),                        # column masks
        ],
        out_specs=pl.BlockSpec((None, R, HW), lambda n: (n, 0, 0)),
        scratch_shapes=[
            pltpu.VMEM((R, 2 * PAD + HW), jnp.float32),   # zero-border scratch
            pltpu.VMEM((9 * R, HW), jnp.float32),         # im2col tile
        ],
        compiler_params=pltpu.CompilerParams(
            # Batch grid stays "parallel" so multi-TensorCore chips (v7x) can
            # split it; per-step footprint is made explicit.
            dimension_semantics=("parallel",),
            vmem_limit_bytes=vmem_limit),
    )(x_flat, w1p, b1_row, w2p, b2_row, g_row, bt_row, inm_row, colmask)

    return out.reshape(N, C, H, W)


def _ref_forward(x, w1, b1, w2, b2, gamma, beta):
    """Pure-JAX reference in NCHW / OIHW (matches the PyTorch module)."""
    dn = ("NCHW", "OIHW", "NCHW")
    C = x.shape[1]
    Ch = C // 2

    def conv(v, w, b):
        return jax.lax.conv_general_dilated(
            v, w, (1, 1), "SAME", dimension_numbers=dn) + b.reshape(1, -1, 1, 1)

    lrelu = lambda v: jnp.where(v > 0, v, LEAKY_SLOPE * v)
    r = lrelu(conv(x, w1, b1))
    o1, o2 = r[:, :Ch], r[:, Ch:]
    mean = jnp.mean(o1, axis=(2, 3), keepdims=True)
    var = jnp.mean((o1 - mean) ** 2, axis=(2, 3), keepdims=True)
    o1n = (o1 - mean) / jnp.sqrt(var + EPS)
    o1n = o1n * gamma.reshape(1, Ch, 1, 1) + beta.reshape(1, Ch, 1, 1)
    r = lrelu(conv(jnp.concatenate([o1n, o2], axis=1), w2, b2))
    return x + r


if __name__ == "__main__":
    # Small shapes consistent with the module: batch=2, channels=4, spatial=16.
    N, C, H, W = 2, 4, 16, 16

    key = jax.random.PRNGKey(0)
    kx, k1, k2, k3, k4, k5, k6 = jax.random.split(key, 7)

    x = jax.random.normal(kx, (N, C, H, W), jnp.float32)

    # PyTorch-layout conv weights (Cout, Cin, kh, kw).
    w1 = jax.random.normal(k1, (C, C, 3, 3), jnp.float32) * 0.1
    b1 = jax.random.normal(k2, (C,), jnp.float32) * 0.05
    w2 = jax.random.normal(k3, (C, C, 3, 3), jnp.float32) * 0.1
    b2 = jax.random.normal(k4, (C,), jnp.float32) * 0.05
    # Non-trivial InstanceNorm affine params to exercise that path.
    gamma = 1.0 + 0.1 * jax.random.normal(k5, (C // 2,), jnp.float32)
    beta = 0.1 * jax.random.normal(k6, (C // 2,), jnp.float32)

    ref = jax.block_until_ready(_ref_forward(x, w1, b1, w2, b2, gamma, beta))

    # Default f32 MXU path.
    out = jax.block_until_ready(
        hin_res_block_forward(x, w1, b1, w2, b2, gamma, beta))
    assert out.shape == (N, C, H, W)
    err = float(jnp.max(jnp.abs(out - ref)))
    assert jnp.allclose(out, ref, atol=5e-4, rtol=5e-4), f"f32 max abs err {err}"

    # bf16 MXU operands (f32 accumulate, f32 elementwise): the v6e/v7x fast
    # path; looser tolerance only reflects bf16 operand rounding.
    out_bf16 = jax.block_until_ready(
        hin_res_block_forward(x, w1, b1, w2, b2, gamma, beta,
                              matmul_dtype=jnp.bfloat16))
    err_bf16 = float(jnp.max(jnp.abs(out_bf16 - ref)))
    assert err_bf16 < 0.1, f"bf16 max abs err {err_bf16}"

    print("KERNEL_OK")
</pallas_src>

<mosaic_0001>
module attributes {stable_mosaic.version = 11 : i64} {
  func.func @_hin_res_block_kernel(%arg0: i32, %arg1: memref<1x8x256xf32, #tpu.memory_space<vmem>>, %arg2: memref<3x8x24xf32, #tpu.memory_space<vmem>>, %arg3: memref<8x1xf32, #tpu.memory_space<vmem>>, %arg4: memref<3x8x24xf32, #tpu.memory_space<vmem>>, %arg5: memref<8x1xf32, #tpu.memory_space<vmem>>, %arg6: memref<8x1xf32, #tpu.memory_space<vmem>>, %arg7: memref<8x1xf32, #tpu.memory_space<vmem>>, %arg8: memref<8x1xf32, #tpu.memory_space<vmem>>, %arg9: memref<2x256xf32, #tpu.memory_space<vmem>>, %arg10: memref<1x8x256xf32, #tpu.memory_space<vmem>>, %arg11: memref<8x512xf32, #tpu.memory_space<vmem>>, %arg12: memref<72x256xf32, #tpu.memory_space<vmem>>) attributes {dimension_semantics = [#tpu.dimension_semantics<parallel>], iteration_bounds = array<i64: 1>, scalar_prefetch = 0 : i64, scratch_operands = 2 : i64, tpu.core_type = #tpu.core_type<tc>, window_params = [{transform_indices = @transform_0, window_bounds = array<i64: 1, 8, 256>}, {pipeline_mode = #tpu.pipeline_mode<synchronous>, transform_indices = @transform_1, window_bounds = array<i64: 3, 8, 24>}, {pipeline_mode = #tpu.pipeline_mode<synchronous>, transform_indices = @transform_2, window_bounds = array<i64: 8, 1>}, {pipeline_mode = #tpu.pipeline_mode<synchronous>, transform_indices = @transform_3, window_bounds = array<i64: 3, 8, 24>}, {pipeline_mode = #tpu.pipeline_mode<synchronous>, transform_indices = @transform_4, window_bounds = array<i64: 8, 1>}, {pipeline_mode = #tpu.pipeline_mode<synchronous>, transform_indices = @transform_5, window_bounds = array<i64: 8, 1>}, {pipeline_mode = #tpu.pipeline_mode<synchronous>, transform_indices = @transform_6, window_bounds = array<i64: 8, 1>}, {pipeline_mode = #tpu.pipeline_mode<synchronous>, transform_indices = @transform_7, window_bounds = array<i64: 8, 1>}, {pipeline_mode = #tpu.pipeline_mode<synchronous>, transform_indices = @transform_8, window_bounds = array<i64: 2, 256>}, {transform_indices = @transform_9, window_bounds = array<i64: 1, 8, 256>}]} {
    %cst = arith.constant 0.000000e+00 : f32
    %0 = vector.broadcast %cst : f32 to vector<8x128xf32>
    %c0 = arith.constant 0 : index
    %c0_0 = arith.constant 0 : index
    %1 = vector.load %arg11[%c0, %c0_0] : memref<8x512xf32, #tpu.memory_space<vmem>>, vector<8x128xf32>
    tpu.vector_store %arg11[%c0, %c0_0], %0 {strides = array<i32>} : memref<8x512xf32, #tpu.memory_space<vmem>>, vector<8x128xf32>,
    %c0_1 = arith.constant 0 : index
    %c384 = arith.constant 384 : index
    %2 = vector.load %arg11[%c0_1, %c384] : memref<8x512xf32, #tpu.memory_space<vmem>>, vector<8x128xf32>
    tpu.vector_store %arg11[%c0_1, %c384], %0 {strides = array<i32>} : memref<8x512xf32, #tpu.memory_space<vmem>>, vector<8x128xf32>,
    %c0_2 = arith.constant 0 : index
    %c0_3 = arith.constant 0 : index
    %c0_4 = arith.constant 0 : index
    %3 = vector.load %arg1[%c0_2, %c0_3, %c0_4] : memref<1x8x256xf32, #tpu.memory_space<vmem>>, vector<1x8x256xf32>
    %4 = vector.shape_cast %3 : vector<1x8x256xf32> to vector<8x256xf32>
    %c0_5 = arith.constant 0 : index
    %c0_6 = arith.constant 0 : index
    %5 = vector.load %arg9[%c0_5, %c0_6] : memref<2x256xf32, #tpu.memory_space<vmem>>, vector<1x256xf32>
    %6 = vector.shape_cast %5 : vector<1x256xf32> to vector<1x256xf32>
    %7 = vector.broadcast %6 : vector<1x256xf32> to vector<8x256xf32>
    %c1 = arith.constant 1 : index
    %c0_7 = arith.constant 0 : index
    %8 = vector.load %arg9[%c1, %c0_7] : memref<2x256xf32, #tpu.memory_space<vmem>>, vector<1x256xf32>
    %9 = vector.shape_cast %8 : vector<1x256xf32> to vector<1x256xf32>
    %10 = vector.broadcast %9 : vector<1x256xf32> to vector<8x256xf32>
    %c0_8 = arith.constant 0 : index
    %c128 = arith.constant 128 : index
    %11 = vector.load %arg11[%c0_8, %c128] : memref<8x512xf32, #tpu.memory_space<vmem>>, vector<8x256xf32>
    tpu.vector_store %arg11[%c0_8, %c128], %4 {strides = array<i32>} : memref<8x512xf32, #tpu.memory_space<vmem>>, vector<8x256xf32>,
    %c0_9 = arith.constant 0 : index
    %c111 = arith.constant 111 : index
    %12 = vector.load %arg11[%c0_9, %c111] : memref<8x512xf32, #tpu.memory_space<vmem>>, vector<8x256xf32>
    %c0_10 = arith.constant 0 : index
    %c0_11 = arith.constant 0 : index
    %13 = vector.load %arg12[%c0_10, %c0_11] : memref<72x256xf32, #tpu.memory_space<vmem>>, vector<8x256xf32>
    tpu.vector_store %arg12[%c0_10, %c0_11], %12 {strides = array<i32>} : memref<72x256xf32, #tpu.memory_space<vmem>>, vector<8x256xf32>,
    %c0_12 = arith.constant 0 : index
    %c127 = arith.constant 127 : index
    %14 = vector.load %arg11[%c0_12, %c127] : memref<8x512xf32, #tpu.memory_space<vmem>>, vector<8x256xf32>
    %c8 = arith.constant 8 : index
    %c0_13 = arith.constant 0 : index
    %15 = vector.load %arg12[%c8, %c0_13] : memref<72x256xf32, #tpu.memory_space<vmem>>, vector<8x256xf32>
    tpu.vector_store %arg12[%c8, %c0_13], %14 {strides = array<i32>} : memref<72x256xf32, #tpu.memory_space<vmem>>, vector<8x256xf32>,
    %c0_14 = arith.constant 0 : index
    %c143 = arith.constant 143 : index
    %16 = vector.load %arg11[%c0_14, %c143] : memref<8x512xf32, #tpu.memory_space<vmem>>, vector<8x256xf32>
    %c16 = arith.constant 16 : index
    %c0_15 = arith.constant 0 : index
    %17 = vector.load %arg12[%c16, %c0_15] : memref<72x256xf32, #tpu.memory_space<vmem>>, vector<8x256xf32>
    tpu.vector_store %arg12[%c16, %c0_15], %16 {strides = array<i32>} : memref<72x256xf32, #tpu.memory_space<vmem>>, vector<8x256xf32>,
    %c0_16 = arith.constant 0 : index
    %c112 = arith.constant 112 : index
    %18 = vector.load %arg11[%c0_16, %c112] : memref<8x512xf32, #tpu.memory_space<vmem>>, vector<8x256xf32>
    %c24 = arith.constant 24 : index
    %c0_17 = arith.constant 0 : index
    %19 = vector.load %arg12[%c24, %c0_17] : memref<72x256xf32, #tpu.memory_space<vmem>>, vector<8x256xf32>
    tpu.vector_store %arg12[%c24, %c0_17], %18 {strides = array<i32>} : memref<72x256xf32, #tpu.memory_space<vmem>>, vector<8x256xf32>,
    %c0_18 = arith.constant 0 : index
    %c128_19 = arith.constant 128 : index
    %20 = vector.load %arg11[%c0_18, %c128_19] : memref<8x512xf32, #tpu.memory_space<vmem>>, vector<8x256xf32>
    %c32 = arith.constant 32 : index
    %c0_20 = arith.constant 0 : index
    %21 = vector.load %arg12[%c32, %c0_20] : memref<72x256xf32, #tpu.memory_space<vmem>>, vector<8x256xf32>
    tpu.vector_store %arg12[%c32, %c0_20], %20 {strides = array<i32>} : memref<72x256xf32, #tpu.memory_space<vmem>>, vector<8x256xf32>,
    %c0_21 = arith.constant 0 : index
    %c144 = arith.constant 144 : index
    %22 = vector.load %arg11[%c0_21, %c144] : memref<8x512xf32, #tpu.memory_space<vmem>>, vector<8x256xf32>
    %c40 = arith.constant 40 : index
    %c0_22 = arith.constant 0 : index
    %23 = vector.load %arg12[%c40, %c0_22] : memref<72x256xf32, #tpu.memory_space<vmem>>, vector<8x256xf32>
    tpu.vector_store %arg12[%c40, %c0_22], %22 {strides = array<i32>} : memref<72x256xf32, #tpu.memory_space<vmem>>, vector<8x256xf32>,
    %c0_23 = arith.constant 0 : index
    %c113 = arith.constant 113 : index
    %24 = vector.load %arg11[%c0_23, %c113] : memref<8x512xf32, #tpu.memory_space<vmem>>, vector<8x256xf32>
    %c48 = arith.constant 48 : index
    %c0_24 = arith.constant 0 : index
    %25 = vector.load %arg12[%c48, %c0_24] : memref<72x256xf32, #tpu.memory_space<vmem>>, vector<8x256xf32>
    tpu.vector_store %arg12[%c48, %c0_24], %24 {strides = array<i32>} : memref<72x256xf32, #tpu.memory_space<vmem>>, vector<8x256xf32>,
    %c0_25 = arith.constant 0 : index
    %c129 = arith.constant 129 : index
    %26 = vector.load %arg11[%c0_25, %c129] : memref<8x512xf32, #tpu.memory_space<vmem>>, vector<8x256xf32>
    %c56 = arith.constant 56 : index
    %c0_26 = arith.constant 0 : index
    %27 = vector.load %arg12[%c56, %c0_26] : memref<72x256xf32, #tpu.memory_space<vmem>>, vector<8x256xf32>
    tpu.vector_store %arg12[%c56, %c0_26], %26 {strides = array<i32>} : memref<72x256xf32, #tpu.memory_space<vmem>>, vector<8x256xf32>,
    %c0_27 = arith.constant 0 : index
    %c145 = arith.constant 145 : index
    %28 = vector.load %arg11[%c0_27, %c145] : memref<8x512xf32, #tpu.memory_space<vmem>>, vector<8x256xf32>
    %c64 = arith.constant 64 : index
    %c0_28 = arith.constant 0 : index
    %29 = vector.load %arg12[%c64, %c0_28] : memref<72x256xf32, #tpu.memory_space<vmem>>, vector<8x256xf32>
    tpu.vector_store %arg12[%c64, %c0_28], %28 {strides = array<i32>} : memref<72x256xf32, #tpu.memory_space<vmem>>, vector<8x256xf32>,
    %c1_29 = arith.constant 1 : index
    %c0_30 = arith.constant 0 : index
    %c0_31 = arith.constant 0 : index
    %30 = vector.load %arg2[%c1_29, %c0_30, %c0_31] : memref<3x8x24xf32, #tpu.memory_space<vmem>>, vector<1x8x24xf32>
    %31 = vector.shape_cast %30 : vector<1x8x24xf32> to vector<8x24xf32>
    %c24_32 = arith.constant 24 : index
    %c0_33 = arith.constant 0 : index
    %32 = vector.load %arg12[%c24_32, %c0_33] : memref<72x256xf32, #tpu.memory_space<vmem>>, vector<24x256xf32>
    %cst_34 = arith.constant dense<0.000000e+00> : vector<8x256xf32>
    %33 = tpu.matmul %31, %32, %cst_34 {dimension_numbers = #tpu.dot_dimension_numbers<[1], [0], [0], [1], [0, 0, 1, 1], [], []>} : vector<8x24xf32>, vector<24x256xf32>, vector<8x256xf32> -> vector<8x256xf32>
    %c0_35 = arith.constant 0 : index
    %c0_36 = arith.constant 0 : index
    %c0_37 = arith.constant 0 : index
    %34 = vector.load %arg2[%c0_35, %c0_36, %c0_37] : memref<3x8x24xf32, #tpu.memory_space<vmem>>, vector<1x8x24xf32>
    %35 = vector.shape_cast %34 : vector<1x8x24xf32> to vector<8x24xf32>
    %c0_38 = arith.constant 0 : index
    %c0_39 = arith.constant 0 : index
    %36 = vector.load %arg12[%c0_38, %c0_39] : memref<72x256xf32, #tpu.memory_space<vmem>>, vector<24x256xf32>
    %cst_40 = arith.constant dense<0.000000e+00> : vector<8x256xf32>
    %37 = tpu.matmul %35, %36, %cst_40 {dimension_numbers = #tpu.dot_dimension_numbers<[1], [0], [0], [1], [0, 0, 1, 1], [], []>} : vector<8x24xf32>, vector<24x256xf32>, vector<8x256xf32> -> vector<8x256xf32>
    %38 = arith.mulf %7, %37 : vector<8x256xf32>
    %39 = arith.addf %33, %38 : vector<8x256xf32>
    %c2 = arith.constant 2 : index
    %c0_41 = arith.constant 0 : index
    %c0_42 = arith.constant 0 : index
    %40 = vector.load %arg2[%c2, %c0_41, %c0_42] : memref<3x8x24xf32, #tpu.memory_space<vmem>>, vector<1x8x24xf32>
    %41 = vector.shape_cast %40 : vector<1x8x24xf32> to vector<8x24xf32>
    %c48_43 = arith.constant 48 : index
    %c0_44 = arith.constant 0 : index
    %42 = vector.load %arg12[%c48_43, %c0_44] : memref<72x256xf32, #tpu.memory_space<vmem>>, vector<24x256xf32>
    %cst_45 = arith.constant dense<0.000000e+00> : vector<8x256xf32>
    %43 = tpu.matmul %41, %42, %cst_45 {dimension_numbers = #tpu.dot_dimension_numbers<[1], [0], [0], [1], [0, 0, 1, 1], [], []>} : vector<8x24xf32>, vector<24x256xf32>, vector<8x256xf32> -> vector<8x256xf32>
    %44 = arith.mulf %10, %43 : vector<8x256xf32>
    %45 = arith.addf %39, %44 : vector<8x256xf32>
    %c0_46 = arith.constant 0 : index
    %c0_47 = arith.constant 0 : index
    %46 = vector.load %arg3[%c0_46, %c0_47] : memref<8x1xf32, #tpu.memory_space<vmem>>, vector<8x1xf32>
    %47 = vector.broadcast %46 : vector<8x1xf32> to vector<8x256xf32>
    %48 = arith.addf %45, %47 : vector<8x256xf32>
    %cst_48 = arith.constant 0.000000e+00 : f32
    %49 = vector.broadcast %cst_48 : f32 to vector<8x256xf32>
    %50 = arith.cmpf ogt, %48, %49 : vector<8x256xf32>
    %cst_49 = arith.constant 2.000000e-01 : f32
    %51 = vector.broadcast %cst_49 : f32 to vector<8x256xf32>
    %52 = arith.mulf %51, %48 : vector<8x256xf32>
    %53 = arith.select %50, %48, %52 : vector<8x256xi1>, vector<8x256xf32>
    %cst_50 = arith.constant dense<0.000000e+00> : vector<8xf32>
    %54 = vector.multi_reduction <add>, %53, %cst_50 [1] : vector<8x256xf32> to vector<8xf32>
    %55 = vector.shape_cast %54 : vector<8xf32> to vector<8x1xf32>
    %cst_51 = arith.constant 2.560000e+02 : f32
    %56 = vector.broadcast %cst_51 : f32 to vector<8x1xf32>
    %57 = arith.divf %55, %56 : vector<8x1xf32>
    %58 = vector.broadcast %57 : vector<8x1xf32> to vector<8x256xf32>
    %59 = arith.subf %53, %58 : vector<8x256xf32>
    %60 = arith.mulf %59, %59 : vector<8x256xf32>
    %cst_52 = arith.constant dense<0.000000e+00> : vector<8xf32>
    %61 = vector.multi_reduction <add>, %60, %cst_52 [1] : vector<8x256xf32> to vector<8xf32>
    %62 = vector.shape_cast %61 : vector<8xf32> to vector<8x1xf32>
    %cst_53 = arith.constant 2.560000e+02 : f32
    %63 = vector.broadcast %cst_53 : f32 to vector<8x1xf32>
    %64 = arith.divf %62, %63 : vector<8x1xf32>
    %65 = vector.broadcast %57 : vector<8x1xf32> to vector<8x256xf32>
    %66 = arith.subf %53, %65 : vector<8x256xf32>
    %cst_54 = arith.constant 9.99999974E-6 : f32
    %67 = vector.broadcast %cst_54 : f32 to vector<8x1xf32>
    %68 = arith.addf %64, %67 : vector<8x1xf32>
    %69 = math.rsqrt %68 : vector<8x1xf32>
    %70 = vector.broadcast %69 : vector<8x1xf32> to vector<8x256xf32>
    %71 = arith.mulf %66, %70 : vector<8x256xf32>
    %c0_55 = arith.constant 0 : index
    %c0_56 = arith.constant 0 : index
    %72 = vector.load %arg6[%c0_55, %c0_56] : memref<8x1xf32, #tpu.memory_space<vmem>>, vector<8x1xf32>
    %73 = vector.broadcast %72 : vector<8x1xf32> to vector<8x256xf32>
    %74 = arith.mulf %71, %73 : vector<8x256xf32>
    %c0_57 = arith.constant 0 : index
    %c0_58 = arith.constant 0 : index
    %75 = vector.load %arg7[%c0_57, %c0_58] : memref<8x1xf32, #tpu.memory_space<vmem>>, vector<8x1xf32>
    %76 = vector.broadcast %75 : vector<8x1xf32> to vector<8x256xf32>
    %77 = arith.addf %74, %76 : vector<8x256xf32>
    %c0_59 = arith.constant 0 : index
    %c0_60 = arith.constant 0 : index
    %78 = vector.load %arg8[%c0_59, %c0_60] : memref<8x1xf32, #tpu.memory_space<vmem>>, vector<8x1xf32>
    %cst_61 = arith.constant 5.000000e-01 : f32
    %79 = vector.broadcast %cst_61 : f32 to vector<8x1xf32>
    %80 = arith.cmpf ogt, %78, %79 : vector<8x1xf32>
    %81 = vector.shape_cast %80 : vector<8x1xi1> to vector<8x1xi1>
    %82 = vector.broadcast %81 : vector<8x1xi1> to vector<8x256xi1>
    %83 = arith.select %82, %77, %53 : vector<8x256xi1>, vector<8x256xf32>
    %c0_62 = arith.constant 0 : index
    %c128_63 = arith.constant 128 : index
    %84 = vector.load %arg11[%c0_62, %c128_63] : memref<8x512xf32, #tpu.memory_space<vmem>>, vector<8x256xf32>
    tpu.vector_store %arg11[%c0_62, %c128_63], %83 {strides = array<i32>} : memref<8x512xf32, #tpu.memory_space<vmem>>, vector<8x256xf32>,
    %c0_64 = arith.constant 0 : index
    %c111_65 = arith.constant 111 : index
    %85 = vector.load %arg11[%c0_64, %c111_65] : memref<8x512xf32, #tpu.memory_space<vmem>>, vector<8x256xf32>
    %c0_66 = arith.constant 0 : index
    %c0_67 = arith.constant 0 : index
    %86 = vector.load %arg12[%c0_66, %c0_67] : memref<72x256xf32, #tpu.memory_space<vmem>>, vector<8x256xf32>
    tpu.vector_store %arg12[%c0_66, %c0_67], %85 {strides = array<i32>} : memref<72x256xf32, #tpu.memory_space<vmem>>, vector<8x256xf32>,
    %c0_68 = arith.constant 0 : index
    %c127_69 = arith.constant 127 : index
    %87 = vector.load %arg11[%c0_68, %c127_69] : memref<8x512xf32, #tpu.memory_space<vmem>>, vector<8x256xf32>
    %c8_70 = arith.constant 8 : index
    %c0_71 = arith.constant 0 : index
    %88 = vector.load %arg12[%c8_70, %c0_71] : memref<72x256xf32, #tpu.memory_space<vmem>>, vector<8x256xf32>
    tpu.vector_store %arg12[%c8_70, %c0_71], %87 {strides = array<i32>} : memref<72x256xf32, #tpu.memory_space<vmem>>, vector<8x256xf32>,
    %c0_72 = arith.constant 0 : index
    %c143_73 = arith.constant 143 : index
    %89 = vector.load %arg11[%c0_72, %c143_73] : memref<8x512xf32, #tpu.memory_space<vmem>>, vector<8x256xf32>
    %c16_74 = arith.constant 16 : index
    %c0_75 = arith.constant 0 : index
    %90 = vector.load %arg12[%c16_74, %c0_75] : memref<72x256xf32, #tpu.memory_space<vmem>>, vector<8x256xf32>
    tpu.vector_store %arg12[%c16_74, %c0_75], %89 {strides = array<i32>} : memref<72x256xf32, #tpu.memory_space<vmem>>, vector<8x256xf32>,
    %c0_76 = arith.constant 0 : index
    %c112_77 = arith.constant 112 : index
    %91 = vector.load %arg11[%c0_76, %c112_77] : memref<8x512xf32, #tpu.memory_space<vmem>>, vector<8x256xf32>
    %c24_78 = arith.constant 24 : index
    %c0_79 = arith.constant 0 : index
    %92 = vector.load %arg12[%c24_78, %c0_79] : memref<72x256xf32, #tpu.memory_space<vmem>>, vector<8x256xf32>
    tpu.vector_store %arg12[%c24_78, %c0_79], %91 {strides = array<i32>} : memref<72x256xf32, #tpu.memory_space<vmem>>, vector<8x256xf32>,
    %c0_80 = arith.constant 0 : index
    %c128_81 = arith.constant 128 : index
    %93 = vector.load %arg11[%c0_80, %c128_81] : memref<8x512xf32, #tpu.memory_space<vmem>>, vector<8x256xf32>
    %c32_82 = arith.constant 32 : index
    %c0_83 = arith.constant 0 : index
    %94 = vector.load %arg12[%c32_82, %c0_83] : memref<72x256xf32, #tpu.memory_space<vmem>>, vector<8x256xf32>
    tpu.vector_store %arg12[%c32_82, %c0_83], %93 {strides = array<i32>} : memref<72x256xf32, #tpu.memory_space<vmem>>, vector<8x256xf32>,
    %c0_84 = arith.constant 0 : index
    %c144_85 = arith.constant 144 : index
    %95 = vector.load %arg11[%c0_84, %c144_85] : memref<8x512xf32, #tpu.memory_space<vmem>>, vector<8x256xf32>
    %c40_86 = arith.constant 40 : index
    %c0_87 = arith.constant 0 : index
    %96 = vector.load %arg12[%c40_86, %c0_87] : memref<72x256xf32, #tpu.memory_space<vmem>>, vector<8x256xf32>
    tpu.vector_store %arg12[%c40_86, %c0_87], %95 {strides = array<i32>} : memref<72x256xf32, #tpu.memory_space<vmem>>, vector<8x256xf32>,
    %c0_88 = arith.constant 0 : index
    %c113_89 = arith.constant 113 : index
    %97 = vector.load %arg11[%c0_88, %c113_89] : memref<8x512xf32, #tpu.memory_space<vmem>>, vector<8x256xf32>
    %c48_90 = arith.constant 48 : index
    %c0_91 = arith.constant 0 : index
    %98 = vector.load %arg12[%c48_90, %c0_91] : memref<72x256xf32, #tpu.memory_space<vmem>>, vector<8x256xf32>
    tpu.vector_store %arg12[%c48_90, %c0_91], %97 {strides = array<i32>} : memref<72x256xf32, #tpu.memory_space<vmem>>, vector<8x256xf32>,
    %c0_92 = arith.constant 0 : index
    %c129_93 = arith.constant 129 : index
    %99 = vector.load %arg11[%c0_92, %c129_93] : memref<8x512xf32, #tpu.memory_space<vmem>>, vector<8x256xf32>
    %c56_94 = arith.constant 56 : index
    %c0_95 = arith.constant 0 : index
    %100 = vector.load %arg12[%c56_94, %c0_95] : memref<72x256xf32, #tpu.memory_space<vmem>>, vector<8x256xf32>
    tpu.vector_store %arg12[%c56_94, %c0_95], %99 {strides = array<i32>} : memref<72x256xf32, #tpu.memory_space<vmem>>, vector<8x256xf32>,
    %c0_96 = arith.constant 0 : index
    %c145_97 = arith.constant 145 : index
    %101 = vector.load %arg11[%c0_96, %c145_97] : memref<8x512xf32, #tpu.memory_space<vmem>>, vector<8x256xf32>
    %c64_98 = arith.constant 64 : index
    %c0_99 = arith.constant 0 : index
    %102 = vector.load %arg12[%c64_98, %c0_99] : memref<72x256xf32, #tpu.memory_space<vmem>>, vector<8x256xf32>
    tpu.vector_store %arg12[%c64_98, %c0_99], %101 {strides = array<i32>} : memref<72x256xf32, #tpu.memory_space<vmem>>, vector<8x256xf32>,
    %c1_100 = arith.constant 1 : index
    %c0_101 = arith.constant 0 : index
    %c0_102 = arith.constant 0 : index
    %103 = vector.load %arg4[%c1_100, %c0_101, %c0_102] : memref<3x8x24xf32, #tpu.memory_space<vmem>>, vector<1x8x24xf32>
    %104 = vector.shape_cast %103 : vector<1x8x24xf32> to vector<8x24xf32>
    %c24_103 = arith.constant 24 : index
    %c0_104 = arith.constant 0 : index
    %105 = vector.load %arg12[%c24_103, %c0_104] : memref<72x256xf32, #tpu.memory_space<vmem>>, vector<24x256xf32>
    %cst_105 = arith.constant dense<0.000000e+00> : vector<8x256xf32>
    %106 = tpu.matmul %104, %105, %cst_105 {dimension_numbers = #tpu.dot_dimension_numbers<[1], [0], [0], [1], [0, 0, 1, 1], [], []>} : vector<8x24xf32>, vector<24x256xf32>, vector<8x256xf32> -> vector<8x256xf32>
    %c0_106 = arith.constant 0 : index
    %c0_107 = arith.constant 0 : index
    %c0_108 = arith.constant 0 : index
    %107 = vector.load %arg4[%c0_106, %c0_107, %c0_108] : memref<3x8x24xf32, #tpu.memory_space<vmem>>, vector<1x8x24xf32>
    %108 = vector.shape_cast %107 : vector<1x8x24xf32> to vector<8x24xf32>
    %c0_109 = arith.constant 0 : index
    %c0_110 = arith.constant 0 : index
    %109 = vector.load %arg12[%c0_109, %c0_110] : memref<72x256xf32, #tpu.memory_space<vmem>>, vector<24x256xf32>
    %cst_111 = arith.constant dense<0.000000e+00> : vector<8x256xf32>
    %110 = tpu.matmul %108, %109, %cst_111 {dimension_numbers = #tpu.dot_dimension_numbers<[1], [0], [0], [1], [0, 0, 1, 1], [], []>} : vector<8x24xf32>, vector<24x256xf32>, vector<8x256xf32> -> vector<8x256xf32>
    %111 = arith.mulf %7, %110 : vector<8x256xf32>
    %112 = arith.addf %106, %111 : vector<8x256xf32>
    %c2_112 = arith.constant 2 : index
    %c0_113 = arith.constant 0 : index
    %c0_114 = arith.constant 0 : index
    %113 = vector.load %arg4[%c2_112, %c0_113, %c0_114] : memref<3x8x24xf32, #tpu.memory_space<vmem>>, vector<1x8x24xf32>
    %114 = vector.shape_cast %113 : vector<1x8x24xf32> to vector<8x24xf32>
    %c48_115 = arith.constant 48 : index
    %c0_116 = arith.constant 0 : index
    %115 = vector.load %arg12[%c48_115, %c0_116] : memref<72x256xf32, #tpu.memory_space<vmem>>, vector<24x256xf32>
    %cst_117 = arith.constant dense<0.000000e+00> : vector<8x256xf32>
    %116 = tpu.matmul %114, %115, %cst_117 {dimension_numbers = #tpu.dot_dimension_numbers<[1], [0], [0], [1], [0, 0, 1, 1], [], []>} : vector<8x24xf32>, vector<24x256xf32>, vector<8x256xf32> -> vector<8x256xf32>
    %117 = arith.mulf %10, %116 : vector<8x256xf32>
    %118 = arith.addf %112, %117 : vector<8x256xf32>
    %c0_118 = arith.constant 0 : index
    %c0_119 = arith.constant 0 : index
    %119 = vector.load %arg5[%c0_118, %c0_119] : memref<8x1xf32, #tpu.memory_space<vmem>>, vector<8x1xf32>
    %120 = vector.broadcast %119 : vector<8x1xf32> to vector<8x256xf32>
    %121 = arith.addf %118, %120 : vector<8x256xf32>
    %cst_120 = arith.constant 0.000000e+00 : f32
    %122 = vector.broadcast %cst_120 : f32 to vector<8x256xf32>
    %123 = arith.cmpf ogt, %121, %122 : vector<8x256xf32>
    %cst_121 = arith.constant 2.000000e-01 : f32
    %124 = vector.broadcast %cst_121 : f32 to vector<8x256xf32>
    %125 = arith.mulf %124, %121 : vector<8x256xf32>
    %126 = arith.select %123, %121, %125 : vector<8x256xi1>, vector<8x256xf32>
    %127 = arith.addf %4, %126 : vector<8x256xf32>
    %c0_122 = arith.constant 0 : index
    %c0_123 = arith.constant 0 : index
    %c0_124 = arith.constant 0 : index
    %128 = vector.load %arg10[%c0_122, %c0_123, %c0_124] : memref<1x8x256xf32, #tpu.memory_space<vmem>>, vector<1x8x256xf32>
    %129 = vector.shape_cast %128 : vector<1x8x256xf32> to vector<8x256xf32>
    %130 = vector.shape_cast %127 : vector<8x256xf32> to vector<1x8x256xf32>
    tpu.vector_store %arg10[%c0_122, %c0_123, %c0_124], %130 {strides = array<i32>} : memref<1x8x256xf32, #tpu.memory_space<vmem>>, vector<1x8x256xf32>,
    return
  }
  func.func @transform_0(%arg0: i32) -> (i32, i32, i32) {
    %c0_i32 = arith.constant 0 : i32
    %c0_i32_0 = arith.constant 0 : i32
    %c0_i32_1 = arith.constant 0 : i32
    return %arg0, %c0_i32, %c0_i32_0 : i32, i32, i32
  }
  func.func @transform_1(%arg0: i32) -> (i32, i32, i32) {
    %c0_i32 = arith.constant 0 : i32
    %c0_i32_0 = arith.constant 0 : i32
    %c0_i32_1 = arith.constant 0 : i32
    %c0_i32_2 = arith.constant 0 : i32
    return %c0_i32, %c0_i32_0, %c0_i32_1 : i32, i32, i32
  }
  func.func @transform_2(%arg0: i32) -> (i32, i32) {
    %c0_i32 = arith.constant 0 : i32
    %c0_i32_0 = arith.constant 0 : i32
    %c0_i32_1 = arith.constant 0 : i32
    return %c0_i32, %c0_i32_0 : i32, i32
  }
  func.func @transform_3(%arg0: i32) -> (i32, i32, i32) {
    %c0_i32 = arith.constant 0 : i32
    %c0_i32_0 = arith.constant 0 : i32
    %c0_i32_1 = arith.constant 0 : i32
    %c0_i32_2 = arith.constant 0 : i32
    return %c0_i32, %c0_i32_0, %c0_i32_1 : i32, i32, i32
  }
  func.func @transform_4(%arg0: i32) -> (i32, i32) {
    %c0_i32 = arith.constant 0 : i32
    %c0_i32_0 = arith.constant 0 : i32
    %c0_i32_1 = arith.constant 0 : i32
    return %c0_i32, %c0_i32_0 : i32, i32
  }
  func.func @transform_5(%arg0: i32) -> (i32, i32) {
    %c0_i32 = arith.constant 0 : i32
    %c0_i32_0 = arith.constant 0 : i32
    %c0_i32_1 = arith.constant 0 : i32
    return %c0_i32, %c0_i32_0 : i32, i32
  }
  func.func @transform_6(%arg0: i32) -> (i32, i32) {
    %c0_i32 = arith.constant 0 : i32
    %c0_i32_0 = arith.constant 0 : i32
    %c0_i32_1 = arith.constant 0 : i32
    return %c0_i32, %c0_i32_0 : i32, i32
  }
  func.func @transform_7(%arg0: i32) -> (i32, i32) {
    %c0_i32 = arith.constant 0 : i32
    %c0_i32_0 = arith.constant 0 : i32
    %c0_i32_1 = arith.constant 0 : i32
    return %c0_i32, %c0_i32_0 : i32, i32
  }
  func.func @transform_8(%arg0: i32) -> (i32, i32) {
    %c0_i32 = arith.constant 0 : i32
    %c0_i32_0 = arith.constant 0 : i32
    %c0_i32_1 = arith.constant 0 : i32
    return %c0_i32, %c0_i32_0 : i32, i32
  }
  func.func @transform_9(%arg0: i32) -> (i32, i32, i32) {
    %c0_i32 = arith.constant 0 : i32
    %c0_i32_0 = arith.constant 0 : i32
    %c0_i32_1 = arith.constant 0 : i32
    return %arg0, %c0_i32, %c0_i32_0 : i32, i32, i32
  }
}

</mosaic_0001>

<bundles_post_ra>
// kernel: tpu_custom_call.1
= control target key start
LH: loop header
LB: loop body
LE: loop exit
PB: predicated region body
PF: predicated region fallthrough
CT: control target
= control target key end

     0   :  { %14 = vsyncpa [#allocation5], 0  ;;  %s1391_s0 = inlined_call_operand.hbm [shape: f32[1,8,256], index: 0, kind: input, shape index: {}]   ;;  %s1392_s1 = inlined_call_operand.vmem [shape: f32[3,8,24], index: 1, kind: input, shape index: {}]   ;;  %s1393_s2 = inlined_call_operand.vmem [shape: f32[8,1], index: 2, kind: input, shape index: {}]   ;;  %s1394_s3 = inlined_call_operand.vmem [shape: f32[3,8,24], index: 3, kind: input, shape index: {}]   ;;  %s1395_s4 = inlined_call_operand.vmem [shape: f32[8,1], index: 4, kind: input, shape index: {}]   ;;  %s1396_s5 = inlined_call_operand.vmem [shape: f32[8,1], index: 5, kind: input, shape index: {}]   ;;  %s1397_s6 = inlined_call_operand.vmem [shape: f32[8,1], index: 6, kind: input, shape index: {}]   ;;  %s1398_s7 = inlined_call_operand.vmem [shape: f32[8,1], index: 7, kind: input, shape index: {}]   ;;  %s1399_s8 = inlined_call_operand.vmem [shape: f32[2,256], index: 8, kind: input, shape index: {}]   ;;  %s1400_s9 = inlined_call_operand.hbm [shape: f32[1,8,256], index: 9, kind: output, shape index: {}]  }
   0x1   :  { %15 = vsyncpa [#allocation6], 0  ;;  %s1123_s30 = smov [#allocation4]   ;;  %s1075_s13 = scalar_lea.hbm %s1391_s0, 256 }
   0x2   :  { %s22_s10 = sshll.u32 %s1123_s30, 4  ;;  %p1076_p0 = scmp.ne.s32.totalorder %s1391_s0, %s1075_s13  ;;  %s23_s10 = int_to_ptr.vmem [resolvable:$true] %s22_s10 }
   0x3   :  { %p1079_p1 = scmp.lt.u32.totalorder %s1075_s13, %s1391_s0 }
   0x5   :  { %p1081_p2 = pnand %p1079_p1, %p1076_p0 }
   0x7   :  { %1084 = shalt.err (!%p1081_p2)
}
   0x8   :  { %s1085_s18 = scalar_lea.vmem %s23_s10, 256  ;;  %p1090_p4 = scmp.lt.s32.totalorder %s23_s10, %s23_s10 }
   0x9   :  { %p1086_p3 = scmp.ne.s32.totalorder %s23_s10, %s1085_s18  ;;  %p1091_p5 = scmp.lt.s32.totalorder %s1085_s18, %s1085_s18 }
   0xb   :  { %p1092_p6 = por %p1091_p5, %p1090_p4 }
   0xd   :  { %p1093_p7 = pnand %p1092_p6, %p1086_p3 }
   0xf   :  { %1096 = shalt.err (!%p1093_p7)
}
  0x10   :  { %25 = dma.hbm_to_vmem [thread:$0]  %s1391_s0, 256, %s23_s10, [#allocation5]  }
  0x11   :  { %1119 = dma.done.wait [#allocation5], 256  }
  0x12   :  { %1120 = vsyncadd [#allocation5], 4294967040  ;;  %v1124_v0 = vmov 0.0   ;;  %s1125_s21 = smov 17   ;;  %s1126_s22 = smov 1   ;;  %v1203_v1 = vld [vmem:[#allocation4] sm:$0xff]  ;;  %v51_v62 = vlaneseq }
  0x13   :  { %82 = vrot.lane.b32.xlu1 %v1124_v0, %s1125_s21  ;;  %315 = vmatprep.mubr.f32.mxu0 %v1124_v0  ;;  %v1205_v2 = vld [vmem:[#allocation4 + $0x8] sm:$0xff]  ;;  %s1127_s0 = smov 113   ;;  %s1128_s23 = smov 15   ;;  %v484_v5 = vld [vmem:[%s1393_s2] sm:$0xff]  ;;  %v1133_v6 = vmov 0   ;;  %vm88_vm0 = vcmask 138240  }
  0x14   :  { %391 = vmatprep.mubr.f32.mxu1 %v1124_v0  ;;  %v1021_v3 = vpack.i.bf16 %v1205_v2, %v1203_v1  ;;  %s1129_s24 = smov 16   ;;  %v1041_v4 = vpack.i.bf16 %v1124_v0, %v1205_v2  ;;  %s1130_s25 = smov 112   ;;  %1046 = vset.pattern.permute.xlu1 %v1133_v6  ;;  %v523_v7 = vld [vmem:[%s1397_s6] sm:$0xff]  ;;  %vm107_vm1 = vcmask 7168   ;;  %vm126_vm2 = vcmask 924672   ;;  %v975_v56 = vld [vmem:[%s1392_s1 + $0x8] sm:$0xff] }
  0x15   :  { %s1131_s26 = smov 127   ;;  %s1132_s27 = smov 111   ;;  %1047 = vset.pattern.permute.xlu0 %v1133_v6  ;;  %vm145_vm3 = vcmask 130048   ;;  %vm247_vm4 = vcmask 195584   ;;  %v240_v33 = vld [vmem:[%s1392_s1] sm:$0xff]  ;;  %vm187_vm5 = vcmask 121856  }
  0x16   :  { %1022 = vrot.lane.b32.xlu0 %v1021_v3, %s1125_s21  ;;  %vm206_vm6 = vcmask 1039360   ;;  %vm168_vm7 = vcmask 916480   ;;  %vm225_vm8 = vcmask 908288   ;;  %v978_v60 = vld [vmem:[%s1392_s1 + $0x10] sm:$0xff] }
  0x17   :  { %101 = vrot.lane.b32.xlu1 %v1124_v0, %s1126_s22 }
  0x1a   :  { %1027 = vrot.lane.b32.xlu0 %v1021_v3, %s1126_s22 }
  0x1b   :  { %124 = vrot.lane.b32.xlu1 %v1124_v0, %s1127_s0 }
  0x1e   :  { %122 = vrot.lane.b32.xlu0 %v1205_v2, %s1127_s0 }
  0x1f   :  { %1037 = vrot.lane.b32.xlu1 %v1021_v3, %s1128_s23 }
  0x22   :  { %1032 = vrot.lane.b32.xlu0 %v1021_v3, %s1129_s24  ;;  %v52_v3 = vshrl.u32 %v51_v62, 7 }
  0x23   :  { %120 = vrot.lane.b32.xlu1 %v1203_v1, %s1127_s0 }
  0x26   :  { %1042 = vrot.lane.b32.xlu0 %v1041_v4, %s1131_s26 }
  0x27   :  { %181 = vrot.lane.b32.xlu1 %v1124_v0, %s1128_s23 }
  0x2a   :  { %139 = vrot.lane.b32.xlu0 %v1124_v0, %s1129_s24 }
  0x2b   :  { %164 = vrot.lane.b32.xlu1 %v1205_v2, %s1130_s25 }
  0x2e   :  { %200 = vrot.lane.b32.xlu0 %v1203_v1, %s1131_s26 }
  0x2f   :  { %221 = vrot.lane.b32.xlu1 %v1205_v2, %s1132_s27 }
  0x32   :  { %166 = vrot.lane.b32.xlu0 %v1124_v0, %s1130_s25 }
  0x33   :  { %162 = vrot.lane.b32.xlu1 %v1203_v1, %s1130_s25 }
  0x36   :  { %223 = vrot.lane.b32.xlu0 %v1124_v0, %s1132_s27 }
  0x37   :  { %487 = vperm.xlu1 %1046, %v484_v5   ;;  %v53_v5 = vsub.s32 0, %v52_v3 }
  0x3a   :  { %219 = vrot.lane.b32.xlu0 %v1203_v1, %s1132_s27 }
  0x3b   :  { %526 = vperm.xlu1 %1046, %v523_v7   ;;  %v49_v7 = vld [vmem:[%s1399_s8] ss:$2 sm:$0x3] }
  0x85   :  { %v83_v8 = vpop.permute.xlu1 %82 }
  0x88   :  { %v1023_v11 = vpop.permute.xlu0 %1022 }
  0x89   :  { %v102_v9 = vpop.permute.xlu1 %101  ;;  %v1025_v12 = vunpack.i.h.bf16 %v1023_v11  ;;  %v1024_v13 = vunpack.i.l.bf16 %v1023_v11 }
  0x8b   :  { %v90_v19 = vsel %vm88_vm0, %v1024_v13, %v1025_v12  ;;  %v89_v21 = vsel %vm88_vm0, %v83_v8, %v1024_v13  ;;  %v57_v8 = vsub.s32 1, %v52_v3 }
  0x8c   :  { %v1028_v15 = vpop.permute.xlu0 %1027 }
  0x8d   :  { %v125_v10 = vpop.permute.xlu1 %124  ;;  %v1030_v16 = vunpack.i.h.bf16 %v1028_v15  ;;  %v1029_v17 = vunpack.i.l.bf16 %v1028_v15 }
  0x8f   :  { %v109_v20 = vsel %vm107_vm1, %v1029_v17, %v1030_v16  ;;  %v108_v22 = vsel %vm107_vm1, %v102_v9, %v1029_v17  ;;  %v1284_v9 = vrot.slane %v49_v7, %v53_v5  ;;  %v974_v16 = vld [vmem:[%s1399_s8 + $0x1] ss:$2 sm:$0x3] }
  0x90   :  { %v123_v23 = vpop.permute.xlu0 %122  ;;  %v985_v24 = vpack.c.bf16 %v109_v20, %v90_v19  ;;  %v987_v25 = vpack.c.bf16 %v108_v22, %v89_v21  ;;  %v1295_v19 = vrot.slane %v974_v16, %v57_v8 }
  0x91   :  { %v1038_v14 = vpop.permute.xlu1 %1037  ;;  %v128_v26 = vsel %vm126_vm2, %v123_v23, %v125_v10  ;;  %v1286_v10 = vrot.slane %v49_v7, %v57_v8 }
  0x92   :  { %986 = vmatprep.subr.bf16.mxu0 %v985_v24  ;;  %v1040_v29 = vunpack.i.h.bf16 %v1038_v14  ;;  %v1039_v30 = vunpack.i.l.bf16 %v1038_v14 }
  0x93   :  { %988 = vmatpush1.bf16.msra.mxu0 %v987_v25 }
  0x94   :  { %v1033_v28 = vpop.permute.xlu0 %1032  ;;  %255 = vmatprep.subr.mxu0 %v128_v26  ;;  %v189_v41 = vsel %vm187_vm5, %v1039_v30, %v1040_v29 }
  0x95   :  { %v121_v18 = vpop.permute.xlu1 %120  ;;  %v1035_v31 = vunpack.i.h.bf16 %v1033_v28  ;;  %v1034_v32 = vunpack.i.l.bf16 %v1033_v28 }
  0x96   :  { %v127_v34 = vsel %vm126_vm2, %v121_v18, %v123_v23  ;;  %v1293_v18 = vrot.slane %v974_v16, %v53_v5 }
  0x97   :  { %256 = vmatpush1.msra.mxu0 %v127_v34  ;;  %v147_v35 = vsel %vm145_vm3, %v1034_v32, %v1035_v31  ;;  %v515_v34 = vld [vmem:[%s1396_s5] sm:$0xff] }
  0x98   :  { %v1043_v37 = vpop.permute.xlu0 %1042  ;;  %v989_v38 = vpack.c.bf16 %v1205_v2, %v147_v35  ;;  %976 = vmatmul.mubr.msk.f32.vlgmr.msra.gmra.mrb[0].mxu0 %vm247_vm4, %v240_v33 }
  0x99   :  { %v182_v27 = vpop.permute.xlu1 %181  ;;  %v1045_v39 = vunpack.i.h.bf16 %v1043_v37  ;;  %v1044_v40 = vunpack.i.l.bf16 %v1043_v37  ;;  %473 = vmatprep.mubr.f32.mxu0 %v1124_v0 }
  0x9a   :  { %990 = vmatprep.subr.bf16.mxu1 %v989_v38  ;;  %v188_v49 = vsel %vm187_vm5, %v182_v27, %v1039_v30 }
  0x9b   :  { %v208_v42 = vsel %vm206_vm6, %v1044_v40, %v1045_v39 }
  0x9c   :  { %v140_v44 = vpop.permute.xlu0 %139  ;;  %v993_v45 = vpack.c.bf16 %v208_v42, %v189_v41  ;;  %v531_v42 = vld [vmem:[%s1398_s7] sm:$0xff] }
  0x9d   :  { %v165_v36 = vpop.permute.xlu1 %164  ;;  %v146_v46 = vsel %vm145_vm3, %v140_v44, %v1034_v32  ;;  %vm532_vm11 = vcmp.gt.f32.partialorder %v531_v42, 0.5 }
  0x9e   :  { %994 = vmatprep.subr.bf16.mxu0 %v993_v45  ;;  %v991_v47 = vpack.c.bf16 %v1203_v1, %v146_v46 }
  0xa0   :  { %v201_v48 = vpop.permute.xlu0 %200  ;;  %992 = vmatpush1.bf16.msra.mxu1 %v991_v47 }
  0xa1   :  { %v222_v43 = vpop.permute.xlu1 %221  ;;  %v207_v50 = vsel %vm206_vm6, %v201_v48, %v1044_v40 }
  0xa2   :  { %v995_v52 = vpack.c.bf16 %v207_v50, %v188_v49 }
  0xa4   :  { %v167_v53 = vpop.permute.xlu0 %166  ;;  %996 = vmatpush1.bf16.msra.mxu0 %v995_v52 }
  0xa5   :  { %v163_v51 = vpop.permute.xlu1 %162  ;;  %v170_v55 = vsel %vm168_vm7, %v165_v36, %v167_v53 }
  0xa6   :  { %v169_v54 = vsel %vm168_vm7, %v163_v51, %v165_v36  ;;  %331 = vmatprep.subr.mxu1 %v170_v55 }
  0xa7   :  { %332 = vmatpush1.msra.mxu1 %v169_v54 }
  0xa8   :  { %v224_v57 = vpop.permute.xlu0 %223  ;;  %977 = vmatmul.mubr.msk.f32.vlgmr.msra.gmra.mrb[0].mxu1 %vm247_vm4, %v975_v56 }
  0xa9   :  { %v227_v58 = vsel %vm225_vm8, %v222_v43, %v224_v57  ;;  %772 = vmatprep.mubr.f32.mxu1 %v1124_v0 }
  0xaa   :  { %413 = vmatprep.subr.mxu0 %v227_v58 }
  0xac   :  { %v220_v59 = vpop.permute.xlu0 %219 }
  0xad   :  { %v226_v61 = vsel %vm225_vm8, %v220_v59, %v222_v43  ;;  %v533_v43 = vsel %vm532_vm11, 1, %v1133_v6 }
  0xae   :  { %414 = vmatpush1.msra.mxu0 %v226_v61 }
  0xaf   :  { %979 = vmatmul.mubr.msk.f32.vlgmr.msra.gmra.mrb[2].mxu0 %vm247_vm4, %v978_v60  ;;  %v941_v60 = vld [vmem:[%s1395_s4] sm:$0xff] }
  0xb0   :  { %848 = vmatprep.mubr.f32.mxu0 %v1124_v0 }
  0xb6   :  { %v488_v25 = vpop.permute.xlu1 %487 }
  0xba   :  { %v527_v44 = vpop.permute.xlu1 %526 }
 0x16b   :  { %v317_v63 = vpop.f32.mrb[0].mxu0 }
 0x16c   :  { %v319_v4 = vpop.f32.mrb[1].mxu0  ;;  %v322_v11 = vmul.f32 %v317_v63, %v1284_v9 }
 0x16d   :  { %v323_v12 = vmul.f32 %v319_v4, %v1286_v10 }
 0x17b   :  { %v393_v13 = vpop.f32.mrb[0].mxu1 }
 0x17c   :  { %v394_v14 = vadd.f32 %v393_v13, %v322_v11  ;;  %v395_v15 = vpop.f32.mrb[1].mxu1 }
 0x17d   :  { %v396_v17 = vadd.f32 %v395_v15, %v323_v12 }
 0x182   :  { %v475_v20 = vpop.f32.mrb[2].mxu0 }
 0x183   :  { %v480_v21 = vmul.f32 %v475_v20, %v1293_v18  ;;  %v477_v22 = vpop.f32.mrb[3].mxu0 }
 0x184   :  { %v481_v23 = vmul.f32 %v477_v22, %v1295_v19 }
 0x185   :  { %v482_v24 = vadd.f32 %v480_v21, %v394_v14 }
 0x186   :  { %v483_v26 = vadd.f32 %v481_v23, %v396_v17 }
 0x187   :  { %v490_v27 = vadd.f32 %v488_v25, %v482_v24 }
 0x188   :  { %v491_v28 = vadd.f32 %v488_v25, %v483_v26 }
 0x189   :  { %v494_v29 = vmul.f32 0.2, %v490_v27  ;;  %vm492_vm9 = vcmp.gt.f32.partialorder %v490_v27, 0.0 }
 0x18a   :  { %vm493_vm10 = vcmp.gt.f32.partialorder %v491_v28, 0.0  ;;  %v495_v30 = vmul.f32 0.2, %v491_v28 }
 0x18b   :  { %v496_v31 = vsel %vm492_vm9, %v490_v27, %v494_v29 }
 0x18c   :  { %v497_v32 = vsel %vm493_vm10, %v491_v28, %v495_v30 }
 0x18d   :  { %v498_v33 = vadd.f32 %v497_v32, %v496_v31 }
 0x18f   :  { %499 = vadd.xlane.f32.xlu0 %v498_v33 }
 0x1a5   :  { %518 = vperm.xlu0 %1047, %v515_v34  }
 0x1a9   :  { %588 = vrot.lane.b32.xlu0 %v1124_v0, %s1127_s0 }
 0x1ad   :  { %642 = vrot.lane.b32.xlu0 %v1124_v0, %s1128_s23 }
 0x21c   :  { %v500_v35 = vpop.xlane.xlu0 %499 }
 0x21d   :  { %v502_v36 = vmul.f32 0.00390625, %v500_v35 }
 0x21f   :  { %v503_v37 = vsub.f32 %v496_v31, %v502_v36  ;;  %v504_v38 = vsub.f32 %v497_v32, %v502_v36 }
 0x221   :  { %v505_v39 = vmul.f32 %v503_v37, %v503_v37  ;;  %v506_v40 = vmul.f32 %v504_v38, %v504_v38 }
 0x223   :  { %v507_v41 = vadd.f32 %v506_v40, %v505_v39 }
 0x224   :  { %v519_v6 = vpop.permute.xlu0 %518 }
 0x225   :  { %508 = vadd.xlane.f32.xlu1 %v507_v41 }
 0x228   :  { %v589_v3 = vpop.permute.xlu0 %588 }
 0x22c   :  { %v643_v5 = vpop.permute.xlu0 %642 }
 0x236   :  { %535 = vperm.xlu1 %1046, %v533_v43  }
 0x23a   :  { %548 = vrot.lane.b32.xlu1 %v1124_v0, %s1125_s21 }
 0x23e   :  { %566 = vrot.lane.b32.xlu1 %v1124_v0, %s1126_s22 }
 0x242   :  { %602 = vrot.lane.b32.xlu1 %v1124_v0, %s1129_s24 }
 0x246   :  { %628 = vrot.lane.b32.xlu1 %v1124_v0, %s1130_s25 }
 0x2b2   :  { %v509_v45 = vpop.xlane.xlu1 %508 }
 0x2b3   :  { %v510_v46 = vmul.f32 0.00390625, %v509_v45 }
 0x2b5   :  { %v511_v47 = vadd.f32 1e-05, %v510_v46 }
 0x2b6   :  { %v536_v51 = vpop.permute.xlu1 %535 }
 0x2b7   :  { %1073 = vrsqrt.f32 %v511_v47  ;;  %vm537_vm12 = vcmp.eq.s32.totalorder %v536_v51, 1 }
 0x2ba   :  { %v549_v61 = vpop.permute.xlu1 %548 }
 0x2be   :  { %v567_v62 = vpop.permute.xlu1 %566 }
 0x2c1   :  { %v1074_v48 = vpop.eup %1073 }
 0x2c2   :  { %v513_v49 = vmul.f32 %v1074_v48, %v503_v37  ;;  %v514_v50 = vmul.f32 %v1074_v48, %v504_v38  ;;  %v603_v63 = vpop.permute.xlu1 %602 }
 0x2c4   :  { %v521_v52 = vmul.f32 %v519_v6, %v513_v49  ;;  %v522_v53 = vmul.f32 %v519_v6, %v514_v50 }
 0x2c6   :  { %v529_v54 = vadd.f32 %v527_v44, %v521_v52  ;;  %v530_v55 = vadd.f32 %v527_v44, %v522_v53  ;;  %v629_v4 = vpop.permute.xlu1 %628 }
 0x2c8   :  { %v1318_v56 = vsel %vm537_vm12, %v529_v54, %v496_v31  ;;  %v539_v57 = vsel %vm537_vm12, %v530_v55, %v497_v32  ;;  %v698_v32 = vld [vmem:[%s1394_s3] sm:$0xff]  ;;  %v983_v55 = vld [vmem:[%s1394_s3 + $0x10] sm:$0xff] }
 0x2c9   :  { %v1063_v58 = vpack.i.bf16 %v539_v57, %v1318_v56  ;;  %v1068_v59 = vpack.i.bf16 %v1124_v0, %v539_v57 }
 0x2cb   :  { %1064 = vrot.lane.b32.xlu0 %v1063_v58, %s1128_s23  ;;  %1049 = vrot.lane.b32.xlu1 %v1063_v58, %s1125_s21 }
 0x2cf   :  { %584 = vrot.lane.b32.xlu0 %v1318_v56, %s1127_s0  ;;  %1054 = vrot.lane.b32.xlu1 %v1063_v58, %s1126_s22 }
 0x2d3   :  { %626 = vrot.lane.b32.xlu0 %v539_v57, %s1130_s25  ;;  %586 = vrot.lane.b32.xlu1 %v539_v57, %s1127_s0 }
 0x2d7   :  { %680 = vrot.lane.b32.xlu0 %v539_v57, %s1132_s27  ;;  %1059 = vrot.lane.b32.xlu1 %v1063_v58, %s1129_s24 }
 0x2db   :  { %624 = vrot.lane.b32.xlu0 %v1318_v56, %s1130_s25  ;;  %1069 = vrot.lane.b32.xlu1 %v1068_v59, %s1131_s26 }
 0x2df   :  { %944 = vperm.xlu0 %1047, %v941_v60   ;;  %660 = vrot.lane.b32.xlu1 %v1318_v56, %s1131_s26 }
 0x2e3   :  { %682 = vrot.lane.b32.xlu1 %v1124_v0, %s1132_s27 }
 0x2e7   :  { %678 = vrot.lane.b32.xlu1 %v1318_v56, %s1132_s27 }
 0x33d   :  { %v1050_v7 = vpop.permute.xlu1 %1049  ;;  %v1065_v8 = vpop.permute.xlu0 %1064 }
 0x33e   :  { %v1052_v11 = vunpack.i.h.bf16 %v1050_v7  ;;  %v1051_v12 = vunpack.i.l.bf16 %v1050_v7  ;;  %v1067_v34 = vunpack.i.h.bf16 %v1065_v8  ;;  %v1066_v35 = vunpack.i.l.bf16 %v1065_v8 }
 0x340   :  { %v554_v17 = vsel %vm88_vm0, %v549_v61, %v1051_v12  ;;  %v555_v21 = vsel %vm88_vm0, %v1051_v12, %v1052_v11  ;;  %v649_v45 = vsel %vm187_vm5, %v1066_v35, %v1067_v34  ;;  %v648_v6 = vsel %vm187_vm5, %v643_v5, %v1066_v35 }
 0x341   :  { %v1055_v13 = vpop.permute.xlu1 %1054  ;;  %v585_v14 = vpop.permute.xlu0 %584 }
 0x342   :  { %v1057_v15 = vunpack.i.h.bf16 %v1055_v13  ;;  %v1056_v16 = vunpack.i.l.bf16 %v1055_v13 }
 0x344   :  { %v572_v20 = vsel %vm107_vm1, %v567_v62, %v1056_v16  ;;  %v573_v22 = vsel %vm107_vm1, %v1056_v16, %v1057_v15 }
 0x345   :  { %v999_v23 = vpack.c.bf16 %v572_v20, %v554_v17  ;;  %v587_v24 = vpop.permute.xlu1 %586  ;;  %v627_v25 = vpop.permute.xlu0 %626  ;;  %v997_v26 = vpack.c.bf16 %v573_v22, %v555_v21 }
 0x346   :  { %v591_v27 = vsel %vm126_vm2, %v587_v24, %v589_v3  ;;  %v590_v33 = vsel %vm126_vm2, %v585_v14, %v587_v24  ;;  %v631_v44 = vsel %vm168_vm7, %v627_v25, %v629_v4 }
 0x347   :  { %998 = vmatprep.subr.bf16.mxu1 %v997_v26 }
 0x348   :  { %1000 = vmatpush1.bf16.msra.mxu1 %v999_v23 }
 0x349   :  { %v1060_v28 = vpop.permute.xlu1 %1059  ;;  %712 = vmatprep.subr.mxu1 %v591_v27  ;;  %v681_v31 = vpop.permute.xlu0 %680 }
 0x34a   :  { %v1062_v29 = vunpack.i.h.bf16 %v1060_v28  ;;  %v1061_v30 = vunpack.i.l.bf16 %v1060_v28 }
 0x34c   :  { %v608_v36 = vsel %vm145_vm3, %v603_v63, %v1061_v30  ;;  %713 = vmatpush1.msra.mxu1 %v590_v33  ;;  %v609_v37 = vsel %vm145_vm3, %v1061_v30, %v1062_v29 }
 0x34d   :  { %v1003_v38 = vpack.c.bf16 %v1318_v56, %v608_v36  ;;  %v1070_v39 = vpop.permute.xlu1 %1069  ;;  %v1001_v40 = vpack.c.bf16 %v539_v57, %v609_v37  ;;  %981 = vmatmul.mubr.msk.f32.vlgmr.msra.gmra.mrb[2].mxu1 %vm247_vm4, %v698_v32  ;;  %v625_v43 = vpop.permute.xlu0 %624 }
 0x34e   :  { %v1072_v41 = vunpack.i.h.bf16 %v1070_v39  ;;  %v1071_v42 = vunpack.i.l.bf16 %v1070_v39  ;;  %930 = vmatprep.mubr.f32.mxu1 %v1124_v0  ;;  %v980_v0 = vld [vmem:[%s1394_s3 + $0x8] sm:$0xff]  ;;  %v630_v50 = vsel %vm168_vm7, %v625_v43, %v627_v25  ;;  %s1134_s3 = smov [#allocation7]  }
 0x34f   :  { %1002 = vmatprep.subr.bf16.mxu0 %v1001_v40  ;;  %s965_s25 = sshll.u32 %s1134_s3, 4  ;;  %s966_s25 = int_to_ptr.vmem [resolvable:$true] %s965_s25 }
 0x350   :  { %1004 = vmatpush1.bf16.msra.mxu0 %v1003_v38  ;;  %v667_v46 = vsel %vm206_vm6, %v1071_v42, %v1072_v41  ;;  %s1097_s26 = scalar_lea.vmem %s966_s25, 256  ;;  %p1102_p9 = scmp.lt.s32.totalorder %s966_s25, %s966_s25 }
 0x351   :  { %v661_v47 = vpop.permute.xlu1 %660  ;;  %788 = vmatprep.subr.mxu0 %v631_v44  ;;  %v1005_v48 = vpack.c.bf16 %v667_v46, %v649_v45  ;;  %p1098_p8 = scmp.ne.s32.totalorder %s966_s25, %s1097_s26  ;;  %p1103_p10 = scmp.lt.s32.totalorder %s1097_s26, %s1097_s26 }
 0x352   :  { %v666_v49 = vsel %vm206_vm6, %v661_v47, %v1071_v42 }
 0x353   :  { %v1007_v51 = vpack.c.bf16 %v666_v49, %v648_v6  ;;  %1006 = vmatprep.subr.bf16.mxu1 %v1005_v48  ;;  %p1104_p11 = por %p1103_p10, %p1102_p9 }
 0x354   :  { %789 = vmatpush1.msra.mxu0 %v630_v50 }
 0x355   :  { %v683_v52 = vpop.permute.xlu1 %682  ;;  %1008 = vmatpush1.bf16.msra.mxu1 %v1007_v51  ;;  %982 = vmatmul.mubr.msk.f32.vlgmr.msra.gmra.mrb[4].mxu0 %vm247_vm4, %v980_v0  ;;  %p1105_p12 = pnand %p1104_p11, %p1098_p8 }
 0x356   :  { %v685_v53 = vsel %vm225_vm8, %v681_v31, %v683_v52 }
 0x357   :  { %870 = vmatprep.subr.mxu1 %v685_v53 }
 0x359   :  { %v679_v54 = vpop.permute.xlu1 %678 }
 0x35a   :  { %v684_v56 = vsel %vm225_vm8, %v679_v54, %v681_v31 }
 0x35b   :  { %871 = vmatpush1.msra.mxu1 %v684_v56 }
 0x35c   :  { %984 = vmatmul.mubr.msk.f32.vlgmr.msra.gmra.mrb[4].mxu1 %vm247_vm4, %v983_v55 }
 0x35e   :  { %v945_v12 = vpop.permute.xlu0 %944 }
 0x420   :  { %v774_v57 = vpop.f32.mrb[2].mxu1 }
 0x421   :  { %v776_v58 = vpop.f32.mrb[3].mxu1  ;;  %v779_v59 = vmul.f32 %v774_v57, %v1284_v9 }
 0x422   :  { %v780_v60 = vmul.f32 %v776_v58, %v1286_v10 }
 0x428   :  { %v850_v61 = vpop.f32.mrb[4].mxu0 }
 0x429   :  { %v851_v62 = vadd.f32 %v850_v61, %v779_v59  ;;  %v852_v63 = vpop.f32.mrb[5].mxu0 }
 0x42a   :  { %v853_v3 = vadd.f32 %v852_v63, %v780_v60 }
 0x42f   :  { %v932_v4 = vpop.f32.mrb[4].mxu1 }
 0x430   :  { %v937_v5 = vmul.f32 %v932_v4, %v1293_v18  ;;  %v934_v7 = vpop.f32.mrb[5].mxu1 }
 0x431   :  { %v938_v8 = vmul.f32 %v934_v7, %v1295_v19 }
 0x432   :  { %v939_v11 = vadd.f32 %v937_v5, %v851_v62 }
 0x433   :  { %v940_v13 = vadd.f32 %v938_v8, %v853_v3 }
 0x434   :  { %v947_v14 = vadd.f32 %v945_v12, %v939_v11 }
 0x435   :  { %v948_v15 = vadd.f32 %v945_v12, %v940_v13 }
 0x436   :  { %v951_v16 = vmul.f32 0.2, %v947_v14  ;;  %vm949_vm13 = vcmp.gt.f32.partialorder %v947_v14, 0.0 }
 0x437   :  { %v952_v9 = vmul.f32 0.2, %v948_v15  ;;  %vm950_vm14 = vcmp.gt.f32.partialorder %v948_v15, 0.0 }
 0x438   :  { %v953_v10 = vsel %vm949_vm13, %v947_v14, %v951_v16 }
 0x439   :  { %v954_v17 = vsel %vm950_vm14, %v948_v15, %v952_v9  ;;  %v955_v20 = vadd.f32 %v953_v10, %v1203_v1 }
 0x43a   :  { %v956_v18 = vadd.f32 %v954_v17, %v1205_v2 }
 0x43b   :  { %957 = vst [vmem:[#allocation7] sm:$0xff] %v955_v20 }
 0x43c   :  { %958 = vst [vmem:[#allocation7 + $0x8] sm:$0xff] %v956_v18 }
 0x43d   :  { %1108 = shalt.err (!%p1105_p12)
}
 0x43e   :  { %s1109_s29 = scalar_lea.hbm %s1400_s9, 256 }
 0x43f   :  { %p1110_p13 = scmp.ne.s32.totalorder %s1400_s9, %s1109_s29  ;;  %p1113_p0 = scmp.lt.u32.totalorder %s1109_s29, %s1400_s9 }
 0x441   :  { %p1115_p1 = pnand %p1113_p0, %p1110_p13 }
 0x443   :  { %1118 = shalt.err (!%p1115_p1)
}
 0x444   :  { %968 = dma.vmem_to_hbm [thread:$0]  %s966_s25, 256, %s1400_s9, [#allocation6]  }
 0x445   :  { %1121 = dma.done.wait [#allocation6], 256  }
 0x446   :  { %1122 = vsyncadd [#allocation6], 4294967040 }
 0x447   :  { %972 = vsyncpa [#allocation5], 1 }
 0x448   :  { %973 = vsyncpa [#allocation6], 1 }

</bundles_post_ra>
